<compile_context>
chip_gen: v7x
topology: tpu7x:2x2x1
jax: 0.10.0
libtpu: 0.0.40
codegen_flags: <defaults>
</compile_context>

<pallas_src>
import numpy as np

import jax
import jax.numpy as jnp
from jax import lax
from jax.experimental import pallas as pl
from jax.experimental.pallas import tpu as pltpu


_LANE = 128
_SUBLANE = 8
_HALF_PI = np.float32(np.pi / 2.0)


def _round_up(x: int, m: int) -> int:
    return (x + m - 1) // m * m


def _freq_table(dim: int, padded: int):
    """Static inv_freq table of flat length `padded` >= dim.

    inv_freq[j] = 10000 ** (-2*(j//2)/dim) for j < dim, 0 for padding.
    (Padded entries produce sin(phase) = 0 or 1 and are sliced off by the
    wrappers — callers must never see the padded slab.)
    """
    j = np.arange(padded)
    k = j // 2
    inv_freq = np.where(j < dim, 10000.0 ** (-2.0 * k / dim), 0.0).astype(np.float32)
    return jnp.asarray(inv_freq)


def _block_cap_bytes() -> int:
    """Per-output-block byte cap for the batched path, per TPU generation."""
    try:
        info = pltpu.get_tpu_info()
        vmem = getattr(info, "vmem_capacity_bytes", None)
        if vmem is not None and int(vmem) <= 64 * 1024 * 1024:
            # v7x-class: 64 MiB VMEM, 3.2 TB/s HBM -> small blocks suffice.
            return 4 * 1024 * 1024
        # v5e / v6e: 128 MiB VMEM, bandwidth-bound -> bigger blocks.
        return 12 * 1024 * 1024
    except Exception:
        return 4 * 1024 * 1024


def _lane_phase(shape):
    """phase[..., j] = (j % 2) * pi/2 computed from lane parity (VALU only)."""
    parity = lax.broadcasted_iota(jnp.int32, shape, len(shape) - 1) & 1
    return parity.astype(jnp.float32) * _HALF_PI


# ---------------------------------------------------------------------------
# Scalar-time kernel: one fused multiply-add-sin over a lane-dense
# (ceil(dim/128), 128) slab.
# ---------------------------------------------------------------------------
def _emb_kernel_scalar(time_ref, freq_ref, out_ref):
    # time_ref: SMEM (1,) f32; freq_ref: VMEM (rows, 128) f32; out: (rows, 128)
    t = time_ref[0]
    phase = _lane_phase(out_ref.shape)
    out_ref[...] = jnp.sin(t * freq_ref[...] + phase).astype(out_ref.dtype)


def sin_pos_emb(time, dim: int, out_dtype=jnp.float32):
    """Pallas implementation of SinPosEmb(dim).forward(time) for scalar `time`."""
    dp = _round_up(dim, _LANE)        # lane-dense padding only
    rows = dp // _LANE                # no grid -> full-array block, (8,128) rule N/A
    inv_freq = _freq_table(dim, dp).reshape(rows, _LANE)

    time_arr = jnp.asarray(time, jnp.float32).reshape(1)
    out = pl.pallas_call(
        _emb_kernel_scalar,
        out_shape=jax.ShapeDtypeStruct((rows, _LANE), out_dtype),
        in_specs=[
            pl.BlockSpec(memory_space=pltpu.SMEM),   # scalar time
            pl.BlockSpec(memory_space=pltpu.VMEM),   # inv_freq table
        ],
        out_specs=pl.BlockSpec(memory_space=pltpu.VMEM),
        cost_estimate=pl.CostEstimate(
            flops=2 * dp, transcendentals=dp, bytes_accessed=4 * (2 * dp + 1)),
    )(time_arr, inv_freq)
    # Row-major flatten matches the row-major table reshape above.
    out = out.reshape(-1)
    return out if dp == dim else out[:dim]


# ---------------------------------------------------------------------------
# Batched-time kernel: out[b, j] = sin(t[b] * inv_freq[j] + phase[j]).
# B on the sublane axis, dim (padded to 128) on the lane axis.
# ---------------------------------------------------------------------------
def _emb_kernel_batched(time_ref, freq_ref, out_ref):
    # time_ref: VMEM (tb, 1); freq_ref: VMEM (1, dp); out: VMEM (tb, dp)
    phase = _lane_phase(out_ref.shape)
    out_ref[...] = jnp.sin(time_ref[...] * freq_ref[...] + phase).astype(out_ref.dtype)


def sin_pos_emb_batched(times, dim: int, out_dtype=jnp.float32):
    """Batched SinPosEmb: times (B,) -> embeddings (B, dim)."""
    times = jnp.asarray(times, jnp.float32).reshape(-1)
    b = times.shape[0]
    dp = _round_up(dim, _LANE)
    bp = _round_up(max(b, 1), _SUBLANE)

    # Tile the batch axis so each output block stays within the per-generation
    # cap (v7x-safe), amortizing grid-step overhead on v5e/v6e.
    max_block_bytes = _block_cap_bytes()
    rows_cap = max(_SUBLANE, (max_block_bytes // (dp * 4)) // _SUBLANE * _SUBLANE)
    tb = min(bp, rows_cap)
    # For large B that would otherwise run as a single grid step, split into 2
    # so dimension_semantics=("parallel",) can shard across TensorCores (v7x).
    if tb == bp and bp >= 4 * _SUBLANE and (bp // 2) % _SUBLANE == 0:
        tb = bp // 2
    bp = _round_up(bp, tb)
    grid = (bp // tb,)

    inv_freq = _freq_table(dim, dp).reshape(1, dp)

    # Avoid extra pad/scatter/slice HLOs in the common aligned case.
    if bp == b:
        times_p = times.reshape(b, 1)
    else:
        times_p = jnp.pad(times, (0, bp - b)).reshape(bp, 1)

    out = pl.pallas_call(
        _emb_kernel_batched,
        out_shape=jax.ShapeDtypeStruct((bp, dp), out_dtype),
        grid=grid,
        in_specs=[
            pl.BlockSpec((tb, 1), lambda i: (i, 0)),
            pl.BlockSpec((1, dp), lambda i: (0, 0)),
        ],
        out_specs=pl.BlockSpec((tb, dp), lambda i: (i, 0)),
        compiler_params=pltpu.CompilerParams(dimension_semantics=("parallel",)),
        cost_estimate=pl.CostEstimate(
            flops=2 * bp * dp, transcendentals=bp * dp,
            bytes_accessed=4 * (bp * dp + bp + dp)),
    )(times_p, inv_freq)

    if bp == b and dp == dim:
        return out
    return out[:b, :dim]


# ---------------------------------------------------------------------------
# Pure reference mirroring the PyTorch forward (computed in float64).
# Note: the kernel implements cos(x) as sin(x + fl(pi/2)) in f32 and (like
# PyTorch-in-f32) incurs ~t*2^-24 argument error for large timesteps; the
# tolerances below account for both.
# ---------------------------------------------------------------------------
def sin_pos_emb_ref(time, dim: int):
    t = float(np.asarray(time))
    half = dim // 2
    k = np.arange(half, dtype=np.float64)
    e = t / 10000.0 ** (2.0 * k / dim)
    emb = np.stack((np.sin(e), np.cos(e)), axis=1).reshape(-1)
    if dim % 2 == 1:
        extra = np.sin(t / 10000.0 ** (2.0 * half / dim))
        emb = np.concatenate((emb, np.asarray([extra])))
    return emb


if __name__ == "__main__":
    key = jax.random.PRNGKey(0)
    k1, k2, k3 = jax.random.split(key, 3)
    # Typical diffusion-style integer timesteps.
    t_scalar = jax.random.randint(k1, (), 0, 1000).astype(jnp.float32)
    t_batch = jax.random.randint(k2, (5,), 0, 1000).astype(jnp.float32)
    t_aligned = jax.random.randint(k3, (8,), 0, 1000).astype(jnp.float32)

    # Scalar path, even and odd dim (odd dim exercises the trailing sin term).
    for dim in (32, 33):
        out = jax.block_until_ready(sin_pos_emb(t_scalar, dim))
        ref = sin_pos_emb_ref(t_scalar, dim)
        assert out.shape == (dim,)
        tol = 1e-5 + 4e-7 * float(np.asarray(t_scalar))
        assert np.allclose(np.asarray(out), ref, atol=tol, rtol=1e-5), f"scalar dim={dim}"

    # Batched path with sublane/lane padding (B=5, dim=32).
    outb = jax.block_until_ready(sin_pos_emb_batched(t_batch, 32))
    refb = np.stack([sin_pos_emb_ref(t, 32) for t in np.asarray(t_batch)])
    assert outb.shape == (5, 32)
    tol = 1e-5 + 4e-7 * float(np.max(np.asarray(t_batch)))
    assert np.allclose(np.asarray(outb), refb, atol=tol, rtol=1e-5), "batched padded"

    # Batched path, fully aligned fast path (no wrapper pad/slice): B=8, dim=128.
    outa = jax.block_until_ready(sin_pos_emb_batched(t_aligned, 128))
    refa = np.stack([sin_pos_emb_ref(t, 128) for t in np.asarray(t_aligned)])
    assert outa.shape == (8, 128)
    tol = 1e-5 + 4e-7 * float(np.max(np.asarray(t_aligned)))
    assert np.allclose(np.asarray(outa), refa, atol=tol, rtol=1e-5), "batched aligned"

    print("KERNEL_OK")
</pallas_src>

<mosaic_0001>
module attributes {stable_mosaic.version = 11 : i64} {
  func.func @_emb_kernel_scalar(%arg0: memref<1xf32, #tpu.memory_space<smem>>, %arg1: memref<1x128xf32, #tpu.memory_space<vmem>>, %arg2: memref<1x128xf32, #tpu.memory_space<vmem>>) attributes {dimension_semantics = [], scalar_prefetch = 0 : i64, scratch_operands = 0 : i64, tpu.core_type = #tpu.core_type<tc>} {
    %c0 = arith.constant 0 : index
    %0 = memref.load %arg0[%c0] : memref<1xf32, #tpu.memory_space<smem>>
    %1 = tpu.iota {dimensions = array<i32: 1>} : vector<1x128xi32>
    %c1_i32 = arith.constant 1 : i32
    %2 = vector.broadcast %c1_i32 : i32 to vector<1x128xi32>
    %3 = arith.andi %1, %2 : vector<1x128xi32>
    %4 = arith.sitofp %3 : vector<1x128xi32> to vector<1x128xf32>
    %cst = arith.constant 1.57079637 : f32
    %5 = vector.broadcast %cst : f32 to vector<1x128xf32>
    %6 = arith.mulf %4, %5 : vector<1x128xf32>
    %c0_0 = arith.constant 0 : index
    %c0_1 = arith.constant 0 : index
    %7 = vector.load %arg1[%c0_0, %c0_1] : memref<1x128xf32, #tpu.memory_space<vmem>>, vector<1x128xf32>
    %8 = vector.broadcast %0 : f32 to vector<1x128xf32>
    %9 = arith.mulf %8, %7 : vector<1x128xf32>
    %10 = arith.addf %9, %6 : vector<1x128xf32>
    %11 = math.sin %10 : vector<1x128xf32>
    %c0_2 = arith.constant 0 : index
    %c0_3 = arith.constant 0 : index
    %12 = vector.load %arg2[%c0_2, %c0_3] : memref<1x128xf32, #tpu.memory_space<vmem>>, vector<1x128xf32>
    tpu.vector_store %arg2[%c0_2, %c0_3], %11 {strides = array<i32>} : memref<1x128xf32, #tpu.memory_space<vmem>>, vector<1x128xf32>,
    return
  }
}

</mosaic_0001>

<bundles_post_ra>
// kernel: tpu_custom_call.1
= control target key start
LH: loop header
LB: loop body
LE: loop exit
PB: predicated region body
PF: predicated region fallthrough
CT: control target
= control target key end

     0   :  { %v14_v0 = vlaneseq  ;;  %s246_s0 = inlined_call_operand.<no memory space> [shape: f32[1], index: 0, kind: input, shape index: {}]   ;;  %s247_s1 = inlined_call_operand.vmem [shape: f32[1,128], index: 1, kind: input, shape index: {}]   ;;  %s248_s2 = inlined_call_operand.hbm [shape: f32[1,128], index: 2, kind: output, shape index: {}]  }
   0x2   :  { %v15_v1 = vand.u32 127, %v14_v0 }
   0x3   :  { %8 = vsyncpa [#allocation4], 0  ;;  %v19_v2 = vld [vmem:[%s247_s1] sm:$0x1]  ;;  %v20_v3 = vstv %s246_s0  ;;  %v185_v20 = vmov 683565275  }
   0x4   :  { %v16_v4 = vand.u32 1, %v15_v1  ;;  %v21_v6 = vmul.f32 %v20_v3, %v19_v2  ;;  %v186_v22 = vmov 2475754826   ;;  %v187_v24 = vmov 2131351028   ;;  %s191_s0 = smov [#allocation3]  }
   0x5   :  { %v188_v26 = vmov 2102212464   ;;  %v189_v28 = vmov 920167782   ;;  %v190_v35 = vmov 1326507024  }
   0x6   :  { %v17_v5 = vcvt.s32.f32 %v16_v4  ;;  %s134_s1 = sshll.u32 %s191_s0, 4  ;;  %s135_s1 = int_to_ptr.vmem [resolvable:$true] %s134_s1 }
   0x7   :  { %s161_s13 = scalar_lea.vmem %s135_s1, 16  ;;  %s165_s14 = scalar_lea.vmem %s135_s1, 32 }
   0x8   :  { %v18_v7 = vmul.f32 1.5707964, %v17_v5  ;;  %p162_p0 = scmp.ne.s32.totalorder %s135_s1, %s161_s13  ;;  %p166_p1 = scmp.lt.s32.totalorder %s135_s1, %s135_s1 }
   0x9   :  { %p167_p2 = scmp.lt.s32.totalorder %s165_s14, %s161_s13 }
   0xa   :  { %v213_v8 = vadd.f32 %v21_v6, %v18_v7 }
   0xb   :  { %p168_p3 = por %p167_p2, %p166_p1 }
   0xc   :  { %v26_v9 = vand.u32 2139095040, %v213_v8  ;;  %v23_v11 = vand.u32 2147483647, %v213_v8  ;;  %vm25_vm7 = vcmp.lt.s32.totalorder %v213_v8, 0  ;;  %vm115_vm12 = vweird.f32 %v213_v8 }
   0xd   :  { %p169_p4 = pnand %p168_p3, %p162_p0 }
   0xe   :  { %v27_v10 = vshrl.u32 %v26_v9, 23  ;;  %v30_v14 = vand.u32 8388607, %v23_v11  ;;  %vm24_vm8 = vcmp.le.f32.partialorder %v23_v11, 0.7853982 }
  0x10   :  { %v142_v12 = vadd.s32 4294967169, %v27_v10  ;;  %v31_v17 = vor.u32 8388608, %v30_v14 }
  0x12   :  { %v33_v13 = vadd.s32 1, %v142_v12  ;;  %v71_v37 = vshll.u32 %v31_v17, 8 }
  0x14   :  { %vm34_vm0 = vcmp.gt.s32.totalorder %v33_v13, 0 }
  0x15   :  { %v35_v15 = vsel %vm34_vm0, %v33_v13, 0 }
  0x16   :  { %v37_v16 = vand.u32 31, %v35_v15  ;;  %v36_v18 = vshrl.u32 %v35_v15, 5 }
  0x18   :  { %v38_v19 = vsub.s32 32, %v37_v16  ;;  %v40_v21 = vshll.u32 %v185_v20, %v37_v16  ;;  %v43_v23 = vshll.u32 %v186_v22, %v37_v16  ;;  %v46_v25 = vshll.u32 %v187_v24, %v37_v16 }
  0x19   :  { %v49_v27 = vshll.u32 %v188_v26, %v37_v16  ;;  %v52_v29 = vshll.u32 %v189_v28, %v37_v16  ;;  %vm55_vm1 = vcmp.lt.s32.totalorder %v36_v18, 1  ;;  %vm58_vm2 = vcmp.lt.s32.totalorder %v36_v18, 4 }
  0x1a   :  { %v39_v30 = vshrl.u32 %v185_v20, %v38_v19  ;;  %v41_v31 = vshrl.u32 %v186_v22, %v38_v19  ;;  %v44_v32 = vshrl.u32 %v187_v24, %v38_v19  ;;  %v47_v33 = vshrl.u32 %v188_v26, %v38_v19 }
  0x1b   :  { %v50_v34 = vshrl.u32 %v189_v28, %v38_v19  ;;  %v53_v36 = vshrl.u32 %v190_v35, %v38_v19  ;;  %vm56_vm3 = vcmp.lt.s32.totalorder %v36_v18, 2  ;;  %vm57_vm4 = vcmp.lt.s32.totalorder %v36_v18, 3 }
  0x1c   :  { %v42_v38 = vor.u32 %v41_v31, %v40_v21  ;;  %v45_v39 = vor.u32 %v44_v32, %v43_v23  ;;  %v48_v40 = vor.u32 %v47_v33, %v46_v25 }
  0x1d   :  { %v51_v41 = vor.u32 %v50_v34, %v49_v27  ;;  %v54_v42 = vor.u32 %v53_v36, %v52_v29 }
  0x1e   :  { %v59_v43 = vsel %vm55_vm1, %v39_v30, %v42_v38  ;;  %v60_v44 = vsel %vm58_vm2, %v48_v40, 2102212464  ;;  %v63_v45 = vsel %vm55_vm1, %v42_v38, %v45_v39  ;;  %v67_v46 = vsel %vm55_vm1, %v45_v39, %v48_v40 }
  0x1f   :  { %v61_v47 = vsel %vm57_vm4, %v45_v39, %v60_v44  ;;  %v64_v48 = vsel %vm58_vm2, %v51_v41, 920167782  ;;  %v68_v49 = vsel %vm58_vm2, %v54_v42, 1326507024 }
  0x20   :  { %v65_v50 = vsel %vm57_vm4, %v48_v40, %v64_v48  ;;  %v69_v51 = vsel %vm57_vm4, %v51_v41, %v68_v49  ;;  %v62_v52 = vsel %vm56_vm3, %v59_v43, %v61_v47 }
  0x21   :  { %v66_v53 = vsel %vm56_vm3, %v63_v45, %v65_v50  ;;  %v70_v54 = vsel %vm56_vm3, %v67_v46, %v69_v51  ;;  %v78_v59 = vmul.u32 %v71_v37, %v62_v52 }
  0x22   :  { %v219_v55 = vmul.u32.u64.low %v71_v37, %v70_v54  ;;  %v220_v56 = vmul.u32.u64.high %v71_v37, %v70_v54, %v219_v55  ;;  %v222_v57 = vmul.u32.u64.low %v71_v37, %v66_v53  ;;  %v223_v58 = vmul.u32.u64.high %v71_v37, %v66_v53, %v222_v57 }
  0x24   :  { %vm80_vm5 = vc.u32 %v220_v56, %v222_v57  ;;  %v81_v60 = vadd.s32 1, %v223_v58  ;;  %v79_v7 = vadd.s32 %v222_v57, %v220_v56 }
  0x26   :  { %v82_v61 = vsel %vm80_vm5, %v81_v60, %v223_v58 }
  0x27   :  { %v83_v62 = vadd.s32 %v82_v61, %v78_v59 }
  0x29   :  { %v84_v63 = vadd.s32 536870912, %v83_v62 }
  0x2b   :  { %v85_v0 = vshrl.u32 %v84_v63, 30 }
  0x2d   :  { %v86_v1 = vshll.u32 %v85_v0, 30  ;;  %v109_v21 = vsub.s32 4, %v85_v0 }
  0x2f   :  { %v87_v2 = vsub.s32 %v83_v62, %v86_v1  ;;  %v110_v24 = vsel %vm25_vm7, %v109_v21, %v85_v0 }
  0x30   :  { %v112_v27 = vsel %vm24_vm8, 0, %v110_v24 }
  0x31   :  { %v89_v3 = vsub.s32 0, %v87_v2  ;;  %v116_v28 = vadd.s32 3, %v112_v27 }
  0x33   :  { %v143_v4 = vmin.u32 %v89_v3, %v87_v2  ;;  %v117_v29 = vand.u32 3, %v116_v28 }
  0x35   :  { %v91_v5 = vclz %v143_v4  ;;  %vm122_vm9 = vcmp.eq.s32.totalorder %v117_v29, 2  ;;  %vm119_vm10 = vcmp.eq.s32.totalorder %v117_v29, 0  ;;  %vm118_vm11 = vcmp.lt.s32.totalorder %v117_v29, 2 }
  0x37   :  { %v144_v6 = vadd.s32 4294967294, %v91_v5 }
  0x39   :  { %vm145_vm6 = vcmp.lt.s32.totalorder %v144_v6, 0 }
  0x3a   :  { %v94_v9 = vsel %vm145_vm6, 0, %v144_v6 }
  0x3b   :  { %v95_v10 = vsub.s32 32, %v94_v9  ;;  %v96_v12 = vshll.u32 %v87_v2, %v94_v9  ;;  %v99_v13 = vsub.s32 4294967266, %v94_v9 }
  0x3d   :  { %v97_v14 = vshrl.u32 %v79_v7, %v95_v10  ;;  %v100_v15 = vadd.s32 127, %v99_v13 }
  0x3f   :  { %v98_v16 = vor.u32 %v97_v14, %v96_v12  ;;  %v101_v17 = vshll.u32 %v100_v15, 23 }
  0x41   :  { %v102_v18 = vor.u32 4788187, %v101_v17  ;;  %v105_v19 = vcvt.s32.f32 %v98_v16 }
  0x43   :  { %v103_v20 = vand.u32 2147483647, %v102_v18 }
  0x45   :  { %v106_v22 = vmul.f32 %v105_v19, %v103_v20 }
  0x47   :  { %v107_v23 = vxor.u32 2147483648, %v106_v22 }
  0x49   :  { %v108_v25 = vsel %vm25_vm7, %v107_v23, %v106_v22 }
  0x4a   :  { %v111_v26 = vsel %vm24_vm8, %v213_v8, %v108_v25 }
  0x4b   :  { %157 = vcosq.f32 %v111_v26 }
  0x4c   :  { %159 = vsinq.f32 %v111_v26 }
  0x55   :  { %v158_v30 = vpop.eup %157 }
  0x56   :  { %v160_v31 = vpop.eup %159  ;;  %v123_v32 = vxor.u32 2147483648, %v158_v30 }
  0x57   :  { %v120_v33 = vxor.u32 2147483648, %v160_v31 }
  0x58   :  { %v124_v11 = vsel %vm122_vm9, %v123_v32, %v160_v31 }
  0x59   :  { %v121_v34 = vsel %vm119_vm10, %v158_v30, %v120_v33 }
  0x5a   :  { %v125_v35 = vsel %vm118_vm11, %v121_v34, %v124_v11 }
  0x5b   :  { %v126_v36 = vsel %vm115_vm12, nan, %v125_v35 }
  0x5c   :  { %127 = vst [vmem:[#allocation3] sm:$0x1] %v126_v36 }
  0x5d   :  { %172 = shalt.err (!%p169_p4)
}
  0x5e   :  { %s173_s17 = scalar_lea.hbm %s248_s2, 16 }
  0x5f   :  { %p174_p5 = scmp.ne.s32.totalorder %s248_s2, %s173_s17  ;;  %p177_p6 = scmp.lt.u32.totalorder %s173_s17, %s248_s2 }
  0x61   :  { %p179_p7 = pnand %p177_p6, %p174_p5 }
  0x63   :  { %182 = shalt.err (!%p179_p7)
}
  0x64   :  { %137 = dma.vmem_to_hbm [thread:$0]  %s135_s1, 16, %s248_s2, [#allocation4]  }
  0x65   :  { %183 = dma.done.wait [#allocation4], 16  }
  0x66   :  { %184 = vsyncadd [#allocation4], 4294967280 }
  0x67   :  { %141 = vsyncpa [#allocation4], 1 }

</bundles_post_ra>
